<compile_context>
chip_gen: v6e
topology: v6e:2x2x1
jax: 0.10.0
libtpu: 0.0.40
codegen_flags: <defaults>
</compile_context>

<pallas_src>
import functools

import jax
import jax.numpy as jnp
from jax.experimental import pallas as pl
from jax.experimental.pallas import tpu as pltpu


def _round_up(x, m):
    return ((x + m - 1) // m) * m


def _fc_direct_kernel(x_ref, w_ref, b_ref, o_ref):
    # x_ref: (bm, C), w_ref: (C, classes), b_ref: (1, classes), o_ref: (bm, classes)
    o_ref[...] = (
        jnp.dot(x_ref[...], w_ref[...], preferred_element_type=jnp.float32)
        + b_ref[...]
    )


# Rows per batch tile.  At C=32 f32 this is 1 MiB per input tile (double
# buffered -> 2 MiB) + ~320 KiB output -- far inside VMEM on v5e/v6e/v7x.
_BM_CAP = 8192
# Above this batch size we use >= 2 blocks so the "parallel" batch axis can
# shard across v7x's two TensorCores.  Below it, one block = one grid step.
_SPLIT_THRESHOLD = 2048
# Below this batch size the pallas_call launch overhead dominates; default to
# a plain fused XLA matmul instead (semantics identical).
_SMALL_B_FALLBACK = 256


def fc_direct_pallas(x2d, weight_t, bias2d):
    """x2d: (B, C) f32; weight_t: (C, classes) f32 (already transposed);
    bias2d: (1, classes) f32.  Returns (B, classes) f32."""
    B, C = x2d.shape
    classes = weight_t.shape[1]

    if B <= _SPLIT_THRESHOLD:
        # Single grid step; block == full array so no (8,128) divisibility issue.
        bm = B
    else:
        # At least 2 blocks (v7x megacore), at most _BM_CAP rows per block,
        # rounded up to a sublane multiple of 8 (Pallas masks the ragged tail).
        n_blocks = max(2, pl.cdiv(B, _BM_CAP))
        bm = min(_BM_CAP, _round_up(pl.cdiv(B, n_blocks), 8))
    grid = (pl.cdiv(B, bm),)

    cost = pl.CostEstimate(
        flops=2 * B * C * classes,
        transcendentals=0,
        bytes_accessed=4 * (B * C + C * classes + classes + B * classes),
    )

    return pl.pallas_call(
        _fc_direct_kernel,
        out_shape=jax.ShapeDtypeStruct((B, classes), jnp.float32),
        grid=grid,
        in_specs=[
            pl.BlockSpec((bm, C), lambda i: (i, 0),
                         memory_space=pltpu.MemorySpace.VMEM),
            pl.BlockSpec((C, classes), lambda i: (0, 0),
                         memory_space=pltpu.MemorySpace.VMEM),
            pl.BlockSpec((1, classes), lambda i: (0, 0),
                         memory_space=pltpu.MemorySpace.VMEM),
        ],
        out_specs=pl.BlockSpec((bm, classes), lambda i: (i, 0),
                               memory_space=pltpu.MemorySpace.VMEM),
        compiler_params=pltpu.CompilerParams(
            dimension_semantics=("parallel",)),
        cost_estimate=cost,
    )(x2d, weight_t, bias2d)


@functools.partial(jax.jit, static_argnames=("force_pallas",))
def net_vanilla_nn_crank_forward(x_nchw, weight, bias, force_pallas=False):
    """Reproduces Net_vanilla_NN_crank.forward.

    x_nchw: (B, C, 1, 1) float32 (NCHW; spatial must be 1x1 for the .view)
    weight: (classes, C) float32  -- Conv2d(C, classes, 1) weight squeezed
    bias:   (classes,)  float32
    returns: (xm, zeros(1)) with xm: (B, classes)
    """
    B, C, H, W = x_nchw.shape
    assert H == 1 and W == 1, "view(B, classes) requires 1x1 spatial input"
    classes = weight.shape[0]

    # Metadata-only reshapes under jit (contiguous NCHW); one-time tiny transpose.
    x2d = x_nchw.reshape(B, C)
    w_t = weight.reshape(classes, C).T          # (C, classes)
    aux = jnp.zeros((1,), dtype=jnp.float32)    # torch.zeros(1); constant under jit

    if (not force_pallas) and B <= _SMALL_B_FALLBACK:
        # Overhead-bound regime: a standalone custom call costs more than the
        # ~1 KB of work; let XLA fuse it instead.
        xm = x2d @ w_t + bias[None, :]
        return xm, aux

    xm = fc_direct_pallas(x2d, w_t, bias.reshape(1, classes))
    return xm, aux


if __name__ == "__main__":
    # Small, module-consistent shapes: batch=8, input_channels=32, classes=10.
    B, C, classes = 8, 32, 10

    key = jax.random.PRNGKey(0)
    kx, kw, kb = jax.random.split(key, 3)

    # Deterministic synthetic parameters (Conv2d(C, classes, 1) shapes, squeezed).
    bound = 1.0 / jnp.sqrt(jnp.float32(C))   # mimic PyTorch conv init range
    weight = jax.random.uniform(kw, (classes, C), jnp.float32, -bound, bound)
    bias = jax.random.uniform(kb, (classes,), jnp.float32, -bound, bound)

    # Input in NCHW with 1x1 spatial, as the forward's .view implies.
    x = jax.random.normal(kx, (B, C, 1, 1), jnp.float32)

    ref = x.reshape(B, C) @ weight.T + bias

    # 1) Pallas path at the module's shapes (forced past the small-B fallback).
    xm_pallas, aux = net_vanilla_nn_crank_forward(x, weight, bias,
                                                  force_pallas=True)
    jax.block_until_ready(xm_pallas)
    jax.block_until_ready(aux)
    assert xm_pallas.shape == (B, classes)
    assert aux.shape == (1,)
    assert jnp.allclose(xm_pallas, ref, atol=1e-5, rtol=1e-5)

    # 2) Default path at small B (fused XLA fallback) -- identical semantics.
    xm_fast, aux2 = net_vanilla_nn_crank_forward(x, weight, bias)
    jax.block_until_ready(xm_fast)
    assert jnp.allclose(xm_fast, ref, atol=1e-5, rtol=1e-5)
    assert aux2.shape == (1,)

    # 3) Larger batch exercising the multi-block (grid >= 2) Pallas path.
    B2 = 4096
    x_big = jax.random.normal(jax.random.PRNGKey(1), (B2, C, 1, 1), jnp.float32)
    xm_big, _ = net_vanilla_nn_crank_forward(x_big, weight, bias)
    jax.block_until_ready(xm_big)
    ref_big = x_big.reshape(B2, C) @ weight.T + bias
    assert xm_big.shape == (B2, classes)
    assert jnp.allclose(xm_big, ref_big, atol=1e-4, rtol=1e-5)

    print("KERNEL_OK")
</pallas_src>

<mosaic_0001>
module attributes {stable_mosaic.version = 11 : i64} {
  func.func @_fc_direct_kernel(%arg0: i32, %arg1: memref<8x32xf32, #tpu.memory_space<vmem>>, %arg2: memref<32x10xf32, #tpu.memory_space<vmem>>, %arg3: memref<1x10xf32, #tpu.memory_space<vmem>>, %arg4: memref<8x10xf32, #tpu.memory_space<vmem>>) attributes {dimension_semantics = [#tpu.dimension_semantics<parallel>], iteration_bounds = array<i64: 1>, scalar_prefetch = 0 : i64, scratch_operands = 0 : i64, tpu.core_type = #tpu.core_type<tc>, window_params = [{transform_indices = @transform_0, window_bounds = array<i64: 8, 32>}, {pipeline_mode = #tpu.pipeline_mode<synchronous>, transform_indices = @transform_1, window_bounds = array<i64: 32, 10>}, {pipeline_mode = #tpu.pipeline_mode<synchronous>, transform_indices = @transform_2, window_bounds = array<i64: 1, 10>}, {transform_indices = @transform_3, window_bounds = array<i64: 8, 10>}]} {
    %c0 = arith.constant 0 : index
    %c0_0 = arith.constant 0 : index
    %0 = vector.load %arg1[%c0, %c0_0] : memref<8x32xf32, #tpu.memory_space<vmem>>, vector<8x32xf32>
    %c0_1 = arith.constant 0 : index
    %c0_2 = arith.constant 0 : index
    %1 = vector.load %arg2[%c0_1, %c0_2] : memref<32x10xf32, #tpu.memory_space<vmem>>, vector<32x10xf32>
    %cst = arith.constant dense<0.000000e+00> : vector<8x10xf32>
    %2 = tpu.matmul %0, %1, %cst {dimension_numbers = #tpu.dot_dimension_numbers<[1], [0], [0], [1], [0, 0, 1, 1], [], []>} : vector<8x32xf32>, vector<32x10xf32>, vector<8x10xf32> -> vector<8x10xf32>
    %c0_3 = arith.constant 0 : index
    %c0_4 = arith.constant 0 : index
    %3 = vector.load %arg3[%c0_3, %c0_4] : memref<1x10xf32, #tpu.memory_space<vmem>>, vector<1x10xf32>
    %4 = vector.broadcast %3 : vector<1x10xf32> to vector<8x10xf32>
    %5 = arith.addf %2, %4 : vector<8x10xf32>
    %c0_5 = arith.constant 0 : index
    %c0_6 = arith.constant 0 : index
    %6 = vector.load %arg4[%c0_5, %c0_6] : memref<8x10xf32, #tpu.memory_space<vmem>>, vector<8x10xf32>
    tpu.vector_store %arg4[%c0_5, %c0_6], %5 {strides = array<i32>} : memref<8x10xf32, #tpu.memory_space<vmem>>, vector<8x10xf32>,
    return
  }
  func.func @transform_0(%arg0: i32) -> (i32, i32) {
    %c0_i32 = arith.constant 0 : i32
    %c0_i32_0 = arith.constant 0 : i32
    return %arg0, %c0_i32 : i32, i32
  }
  func.func @transform_1(%arg0: i32) -> (i32, i32) {
    %c0_i32 = arith.constant 0 : i32
    %c0_i32_0 = arith.constant 0 : i32
    %c0_i32_1 = arith.constant 0 : i32
    return %c0_i32, %c0_i32_0 : i32, i32
  }
  func.func @transform_2(%arg0: i32) -> (i32, i32) {
    %c0_i32 = arith.constant 0 : i32
    %c0_i32_0 = arith.constant 0 : i32
    %c0_i32_1 = arith.constant 0 : i32
    return %c0_i32, %c0_i32_0 : i32, i32
  }
  func.func @transform_3(%arg0: i32) -> (i32, i32) {
    %c0_i32 = arith.constant 0 : i32
    %c0_i32_0 = arith.constant 0 : i32
    return %arg0, %c0_i32 : i32, i32
  }
}

</mosaic_0001>

<bundles_post_ra>
// kernel: net_vanilla_nn_crank_forward.1
= control target key start
LH: loop header
LB: loop body
LE: loop exit
PB: predicated region body
PF: predicated region fallthrough
CT: control target
= control target key end

     0   :  { %v160_v1 = vmov 0.0   ;;  %vm161_vm0 = vmmov 0   ;;  %s204_s0 = inlined_call_operand.vmem [shape: f32[8,32], index: 0, kind: input, shape index: {}]   ;;  %s205_s1 = inlined_call_operand.vmem [shape: f32[32,10], index: 1, kind: input, shape index: {}]   ;;  %s206_s2 = inlined_call_operand.vmem [shape: f32[1,10], index: 2, kind: input, shape index: {}]   ;;  %s207_s3 = inlined_call_operand.hbm [shape: f32[8,10], index: 3, kind: output, shape index: {}]  }
   0x1   :  { %v19_v0 = vld [vmem:[%s205_s1 + $0x18] sm:$0xff]  ;;  %124 = vmatprep.subr.mxu0 %v160_v1  ;;  %v18_v2 = vld [vmem:[%s205_s1 + $0x10] sm:$0xff]  ;;  %132 = vmatprep.mubr.msk.f32.mxu0 %vm161_vm0, %v160_v1 }
   0x2   :  { %125 = vmatpush3.msra.mxu0 %v19_v0 }
   0x3   :  { %8 = vsyncpa [#allocation3], 0  ;;  %126 = vmatprep.subr.mxu0 %v160_v1  ;;  %v17_v3 = vld [vmem:[%s205_s1 + $0x8] sm:$0xff]  ;;  %v16_v4 = vld [vmem:[%s205_s1] sm:$0xff]  ;;  %vm27_vm1 = vcmask 261120   ;;  %s162_s24 = smov [#allocation2]  }
   0x4   :  { %127 = vmatpush3.msra.mxu0 %v18_v2  ;;  %v15_v5 = vld [vmem:[%s204_s0] sm:$0xff]  ;;  %s109_s25 = sshll.u32 %s162_s24, 4  ;;  %vm101_vm2 = vcmask 80896   ;;  %s110_s25 = int_to_ptr.vmem [resolvable:$true] %s109_s25 }
   0x5   :  { %128 = vmatprep.subr.mxu0 %v160_v1  ;;  %v117_v6 = vld [vmem:[%s206_s2] ss:$0 sm:$0xff]  ;;  %s138_s1 = scalar_lea.vmem %s110_s25, 128  ;;  %p143_p1 = scmp.lt.s32.totalorder %s110_s25, %s110_s25 }
   0x6   :  { %129 = vmatpush3.msra.mxu0 %v17_v3  ;;  %p139_p0 = scmp.ne.s32.totalorder %s110_s25, %s138_s1  ;;  %p144_p2 = scmp.lt.s32.totalorder %s138_s1, %s138_s1 }
   0x7   :  { %130 = vmatprep.subr.mxu0 %v160_v1 }
   0x8   :  { %131 = vmatpush3.msra.mxu0 %v16_v4  ;;  %p145_p3 = por %p144_p2, %p143_p1 }
   0x9   :  { %133 = vmatmul.mubr.msk.f32.vlgmr.msra.gmra.mxu0 %vm27_vm1, %v15_v5 }
   0xa   :  { %p146_p4 = pnand %p145_p3, %p139_p0 }
  0xc9   :  { %v97_v7 = vpop.f32.mrf.mxu0 }
  0xca   :  { %v98_v8 = vadd.f32 %v117_v6, %v97_v7 }
  0xcb   :  { %v134_v9 = vpop.f32.mrf.mxu0 }
  0xcc   :  { %102 = vst.msk [vmem:[#allocation2] sm:$0xff] %vm101_vm2, %v98_v8 }
  0xcd   :  { %149 = shalt.err (!%p146_p4)
}
  0xce   :  { %112 = dma.vmem_to_hbm [thread:$0]  %s110_s25, 128, %s207_s3, [#allocation3]  }
  0xcf   :  { %158 = dma.done.wait [#allocation3], 128  }
  0xd0   :  { %159 = vsyncadd [#allocation3], 4294967168 }
  0xd1   :  { %116 = vsyncpa [#allocation3], 1 }

</bundles_post_ra>
